<compile_context>
chip_gen: v7x
topology: tpu7x:2x2x1
jax: 0.10.0
libtpu: 0.0.40
codegen_flags: <defaults>
</compile_context>

<pallas_src>
import numpy as np
import jax
import jax.numpy as jnp
from jax import lax
from jax.experimental import pallas as pl
from jax.experimental.pallas import tpu as pltpu


# ----------------------------------------------------------------------------
# Helpers
# ----------------------------------------------------------------------------
def _pick_tile(n, candidates):
    """Largest candidate tile that evenly divides n; falls back to n (full dim)."""
    for t in candidates:
        if t <= n and n % t == 0:
            return t
    return n


def _vmem_limit(working_set_bytes):
    """Scoped-VMEM limit: 2x headroom over the double-buffered working set,
    clamped to stay comfortably inside v7x's 64 MiB physical VMEM."""
    return int(min(max(2 * working_set_bytes + (4 << 20), 16 << 20), 48 << 20))


# ----------------------------------------------------------------------------
# Kernel A: batched input projection for all timesteps (off the serial path).
#   One fused MXU matmul per M-tile; three lane-dense per-gate outputs.
# ----------------------------------------------------------------------------
def input_proj_kernel(x_ref, w_ref, b_ref, gr_ref, gz_ref, gn_ref):
    """x_ref: (tm, emb); w_ref: (emb, 3*hid); b_ref: (1, 3*hid);
    gr/gz/gn_ref: (tm, hid) each (gate order r, z, n)."""
    hid = gr_ref.shape[-1]
    gi = (
        jnp.dot(x_ref[...], w_ref[...], preferred_element_type=jnp.float32)
        + b_ref[...]
    )
    # Gate split inside the kernel (lane sub-slices of a value; not on the
    # serial path).  Production configs with hid % 128 == 0 make these free.
    gr_ref[...] = gi[:, 0:hid].astype(gr_ref.dtype)
    gz_ref[...] = gi[:, hid:2 * hid].astype(gz_ref.dtype)
    gn_ref[...] = gi[:, 2 * hid:3 * hid].astype(gn_ref.dtype)


# ----------------------------------------------------------------------------
# Kernel B: GRU recurrence over a time chunk; h carried across chunks in a
#   VMEM scratch, and inside a chunk in vregs via fori_loop.
# ----------------------------------------------------------------------------
def gru_recurrence_kernel(gi_r_ref, gi_z_ref, gi_n_ref, whh_ref, bhh_ref,
                          h_out_ref, h_scr):
    """gi_*_ref: (chunk, batch, hid)   precomputed input-gate activations
    whh_ref:  (hid, 3*hid)             fused hidden->gate weights (= W_hh^T)
    bhh_ref:  (1, 3*hid)               fused hidden biases
    h_out_ref:(1, batch, hid)          final hidden state
    h_scr:    (batch, hid) VMEM        hidden state carried across chunks
    """
    chunk_len, batch, hid = gi_r_ref.shape

    @pl.when(pl.program_id(0) == 0)
    def _():
        h_scr[...] = jnp.zeros_like(h_scr)

    # Loop-invariant loads hoisted out of the recurrence.
    whh = whh_ref[...]
    bhh = bhh_ref[...]

    def step(t, h):
        # PyTorch GRU (gate order r, z, n), single fused recurrent matmul:
        #   gh = h @ W_hh^T + b_hh              (batch, 3*hid)
        #   r  = sigmoid(gi_r + gh_r)
        #   z  = sigmoid(gi_z + gh_z)
        #   n  = tanh   (gi_n + r * gh_n)
        #   h' = (1 - z) * n + z * h
        gh = jnp.dot(h, whh, preferred_element_type=jnp.float32) + bhh
        r = jax.nn.sigmoid(gi_r_ref[t] + gh[:, 0:hid])
        z = jax.nn.sigmoid(gi_z_ref[t] + gh[:, hid:2 * hid])
        n = jnp.tanh(gi_n_ref[t] + r * gh[:, 2 * hid:3 * hid])
        return (1.0 - z) * n + z * h

    # vreg-pressure-aware unroll: full unroll only for small chunks / small hid.
    unroll = True if (chunk_len <= 16 and hid <= 128) else 2
    h_final = lax.fori_loop(0, chunk_len, step, h_scr[...], unroll=unroll)

    h_scr[...] = h_final
    h_out_ref[0] = h_final.astype(h_out_ref.dtype)


# ----------------------------------------------------------------------------
# Parameter preparation (run once, outside the hot call path).
# ----------------------------------------------------------------------------
def prepare_encoder_params(emb_table, w_ih, w_hh, b_ih, b_hh):
    hid = w_hh.shape[1]
    return dict(
        emb_table=jnp.asarray(emb_table, jnp.float32),
        wih_t=jnp.asarray(w_ih.T, jnp.float32),             # (emb, 3*hid)
        bih=jnp.asarray(b_ih.reshape(1, 3 * hid), jnp.float32),
        whh_t=jnp.asarray(w_hh.T, jnp.float32),             # (hid, 3*hid)
        bhh=jnp.asarray(b_hh.reshape(1, 3 * hid), jnp.float32),
    )


# ----------------------------------------------------------------------------
# Wrapper: Encoder.forward (eval mode).  src: [seq_len, batch] int32.
# Returns hidden: [1, batch, hid] (like nn.GRU's final hidden state).
# ----------------------------------------------------------------------------
@jax.jit
def encoder_forward(src, params):
    emb_table = params["emb_table"]
    wih_t, bih = params["wih_t"], params["bih"]
    whh_t, bhh = params["whh_t"], params["bhh"]

    # Embedding gather + dropout (identity in eval mode).
    embedded = jnp.take(emb_table, src, axis=0)             # (seq, batch, emb) f32
    seq_len, batch, emb_dim = embedded.shape
    hid = whh_t.shape[0]
    M = seq_len * batch

    # --- Kernel A: all-timestep input projection, M-tiled + pipelined.
    x2d = embedded.reshape(M, emb_dim)                      # free contiguous reshape
    tm = _pick_tile(M, (1024, 512, 256, 128, 64, 32, 16, 8))
    a_bytes = 4 * (2 * tm * emb_dim + emb_dim * 3 * hid + 3 * hid
                   + 2 * 3 * tm * hid)
    gi_shape = jax.ShapeDtypeStruct((M, hid), jnp.float32)

    gi_r, gi_z, gi_n = pl.pallas_call(
        input_proj_kernel,
        out_shape=(gi_shape, gi_shape, gi_shape),
        grid=(M // tm,),
        in_specs=[
            pl.BlockSpec((tm, emb_dim), lambda i: (i, 0)),
            pl.BlockSpec((emb_dim, 3 * hid), lambda i: (0, 0)),
            pl.BlockSpec((1, 3 * hid), lambda i: (0, 0)),
        ],
        out_specs=(
            pl.BlockSpec((tm, hid), lambda i: (i, 0)),
            pl.BlockSpec((tm, hid), lambda i: (i, 0)),
            pl.BlockSpec((tm, hid), lambda i: (i, 0)),
        ),
        compiler_params=pltpu.CompilerParams(
            dimension_semantics=("parallel",),
            vmem_limit_bytes=_vmem_limit(a_bytes)),
    )(x2d, wih_t, bih)

    # Contiguous (free) reshapes to (seq, batch, hid) for the recurrence kernel.
    gi_r = gi_r.reshape(seq_len, batch, hid)
    gi_z = gi_z.reshape(seq_len, batch, hid)
    gi_n = gi_n.reshape(seq_len, batch, hid)

    # --- Kernel B: recurrence, time-chunked grid with carried-h scratch.
    chunk = _pick_tile(seq_len, (128, 64, 32, 16, 8, 4, 2, 1))
    b_bytes = 4 * (2 * 3 * chunk * batch * hid + 2 * hid * 3 * hid
                   + 3 * hid + 2 * batch * hid)

    hidden = pl.pallas_call(
        gru_recurrence_kernel,
        out_shape=jax.ShapeDtypeStruct((1, batch, hid), jnp.float32),
        grid=(seq_len // chunk,),
        in_specs=[
            pl.BlockSpec((chunk, batch, hid), lambda c: (c, 0, 0)),
            pl.BlockSpec((chunk, batch, hid), lambda c: (c, 0, 0)),
            pl.BlockSpec((chunk, batch, hid), lambda c: (c, 0, 0)),
            pl.BlockSpec((hid, 3 * hid), lambda c: (0, 0)),
            pl.BlockSpec((1, 3 * hid), lambda c: (0, 0)),
        ],
        out_specs=pl.BlockSpec((1, batch, hid), lambda c: (0, 0, 0)),
        scratch_shapes=[pltpu.VMEM((batch, hid), jnp.float32)],
        compiler_params=pltpu.CompilerParams(
            dimension_semantics=("arbitrary",),
            vmem_limit_bytes=_vmem_limit(b_bytes)),
    )(gi_r, gi_z, gi_n, whh_t, bhh)

    return hidden


# ----------------------------------------------------------------------------
# Pure-JAX reference (lax.scan GRU) for verification.
# ----------------------------------------------------------------------------
def encoder_forward_ref(src, emb_table, w_ih, w_hh, b_ih, b_hh):
    embedded = jnp.take(emb_table, src, axis=0)  # (seq, batch, emb)
    hid = w_hh.shape[1]
    h0 = jnp.zeros((src.shape[1], hid), jnp.float32)

    def step(h, x):
        gi = x @ w_ih.T + b_ih
        gh = h @ w_hh.T + b_hh
        i_r, i_z, i_n = jnp.split(gi, 3, axis=-1)
        h_r, h_z, h_n = jnp.split(gh, 3, axis=-1)
        r = jax.nn.sigmoid(i_r + h_r)
        z = jax.nn.sigmoid(i_z + h_z)
        n = jnp.tanh(i_n + r * h_n)
        h_new = (1.0 - z) * n + z * h
        return h_new, None

    h_final, _ = lax.scan(step, h0, embedded)
    return h_final[None]  # (1, batch, hid)


if __name__ == "__main__":
    # Small shapes consistent with the module.
    input_dim = 50   # vocab size
    emb_dim = 32
    hid_dim = 32
    seq_len = 8
    batch = 2

    key = jax.random.PRNGKey(0)
    k_emb, k_wih, k_whh, k_bih, k_bhh, k_src = jax.random.split(key, 6)

    bound = 1.0 / np.sqrt(hid_dim)
    emb_table = jax.random.normal(k_emb, (input_dim, emb_dim), jnp.float32)
    w_ih = jax.random.uniform(k_wih, (3 * hid_dim, emb_dim), jnp.float32, -bound, bound)
    w_hh = jax.random.uniform(k_whh, (3 * hid_dim, hid_dim), jnp.float32, -bound, bound)
    b_ih = jax.random.uniform(k_bih, (3 * hid_dim,), jnp.float32, -bound, bound)
    b_hh = jax.random.uniform(k_bhh, (3 * hid_dim,), jnp.float32, -bound, bound)

    src = jax.random.randint(k_src, (seq_len, batch), 0, input_dim, jnp.int32)

    params = prepare_encoder_params(emb_table, w_ih, w_hh, b_ih, b_hh)

    hidden = jax.block_until_ready(encoder_forward(src, params))
    hidden_ref = jax.block_until_ready(
        encoder_forward_ref(src, emb_table, w_ih, w_hh, b_ih, b_hh))

    assert hidden.shape == (1, batch, hid_dim), hidden.shape
    np.testing.assert_allclose(np.asarray(hidden), np.asarray(hidden_ref),
                               rtol=1e-5, atol=1e-5)
    print("KERNEL_OK")
</pallas_src>

<mosaic_0001>
module attributes {stable_mosaic.version = 11 : i64} {
  func.func @input_proj_kernel(%arg0: i32, %arg1: memref<16x32xf32, #tpu.memory_space<vmem>>, %arg2: memref<32x96xf32, #tpu.memory_space<vmem>>, %arg3: memref<1x96xf32, #tpu.memory_space<vmem>>, %arg4: memref<16x32xf32, #tpu.memory_space<vmem>>, %arg5: memref<16x32xf32, #tpu.memory_space<vmem>>, %arg6: memref<16x32xf32, #tpu.memory_space<vmem>>) attributes {dimension_semantics = [#tpu.dimension_semantics<parallel>], iteration_bounds = array<i64: 1>, scalar_prefetch = 0 : i64, scratch_operands = 0 : i64, tpu.core_type = #tpu.core_type<tc>, window_params = [{transform_indices = @transform_0, window_bounds = array<i64: 16, 32>}, {pipeline_mode = #tpu.pipeline_mode<synchronous>, transform_indices = @transform_1, window_bounds = array<i64: 32, 96>}, {pipeline_mode = #tpu.pipeline_mode<synchronous>, transform_indices = @transform_2, window_bounds = array<i64: 1, 96>}, {transform_indices = @transform_3, window_bounds = array<i64: 16, 32>}, {transform_indices = @transform_4, window_bounds = array<i64: 16, 32>}, {transform_indices = @transform_5, window_bounds = array<i64: 16, 32>}]} {
    %c0 = arith.constant 0 : index
    %c0_0 = arith.constant 0 : index
    %0 = vector.load %arg1[%c0, %c0_0] : memref<16x32xf32, #tpu.memory_space<vmem>>, vector<16x32xf32>
    %c0_1 = arith.constant 0 : index
    %c0_2 = arith.constant 0 : index
    %1 = vector.load %arg2[%c0_1, %c0_2] : memref<32x96xf32, #tpu.memory_space<vmem>>, vector<32x96xf32>
    %cst = arith.constant dense<0.000000e+00> : vector<16x96xf32>
    %2 = tpu.matmul %0, %1, %cst {dimension_numbers = #tpu.dot_dimension_numbers<[1], [0], [0], [1], [0, 0, 1, 1], [], []>} : vector<16x32xf32>, vector<32x96xf32>, vector<16x96xf32> -> vector<16x96xf32>
    %c0_3 = arith.constant 0 : index
    %c0_4 = arith.constant 0 : index
    %3 = vector.load %arg3[%c0_3, %c0_4] : memref<1x96xf32, #tpu.memory_space<vmem>>, vector<1x96xf32>
    %4 = vector.broadcast %3 : vector<1x96xf32> to vector<16x96xf32>
    %5 = arith.addf %2, %4 : vector<16x96xf32>
    %6 = vector.extract_strided_slice %5 {offsets = [0, 0], sizes = [16, 32], strides = [1, 1]} : vector<16x96xf32> to vector<16x32xf32>
    %c0_5 = arith.constant 0 : index
    %c0_6 = arith.constant 0 : index
    %7 = vector.load %arg4[%c0_5, %c0_6] : memref<16x32xf32, #tpu.memory_space<vmem>>, vector<16x32xf32>
    tpu.vector_store %arg4[%c0_5, %c0_6], %6 {strides = array<i32>} : memref<16x32xf32, #tpu.memory_space<vmem>>, vector<16x32xf32>,
    %8 = vector.extract_strided_slice %5 {offsets = [0, 32], sizes = [16, 32], strides = [1, 1]} : vector<16x96xf32> to vector<16x32xf32>
    %c0_7 = arith.constant 0 : index
    %c0_8 = arith.constant 0 : index
    %9 = vector.load %arg5[%c0_7, %c0_8] : memref<16x32xf32, #tpu.memory_space<vmem>>, vector<16x32xf32>
    tpu.vector_store %arg5[%c0_7, %c0_8], %8 {strides = array<i32>} : memref<16x32xf32, #tpu.memory_space<vmem>>, vector<16x32xf32>,
    %10 = vector.extract_strided_slice %5 {offsets = [0, 64], sizes = [16, 32], strides = [1, 1]} : vector<16x96xf32> to vector<16x32xf32>
    %c0_9 = arith.constant 0 : index
    %c0_10 = arith.constant 0 : index
    %11 = vector.load %arg6[%c0_9, %c0_10] : memref<16x32xf32, #tpu.memory_space<vmem>>, vector<16x32xf32>
    tpu.vector_store %arg6[%c0_9, %c0_10], %10 {strides = array<i32>} : memref<16x32xf32, #tpu.memory_space<vmem>>, vector<16x32xf32>,
    return
  }
  func.func @transform_0(%arg0: i32) -> (i32, i32) {
    %c0_i32 = arith.constant 0 : i32
    %c0_i32_0 = arith.constant 0 : i32
    return %arg0, %c0_i32 : i32, i32
  }
  func.func @transform_1(%arg0: i32) -> (i32, i32) {
    %c0_i32 = arith.constant 0 : i32
    %c0_i32_0 = arith.constant 0 : i32
    %c0_i32_1 = arith.constant 0 : i32
    return %c0_i32, %c0_i32_0 : i32, i32
  }
  func.func @transform_2(%arg0: i32) -> (i32, i32) {
    %c0_i32 = arith.constant 0 : i32
    %c0_i32_0 = arith.constant 0 : i32
    %c0_i32_1 = arith.constant 0 : i32
    return %c0_i32, %c0_i32_0 : i32, i32
  }
  func.func @transform_3(%arg0: i32) -> (i32, i32) {
    %c0_i32 = arith.constant 0 : i32
    %c0_i32_0 = arith.constant 0 : i32
    return %arg0, %c0_i32 : i32, i32
  }
  func.func @transform_4(%arg0: i32) -> (i32, i32) {
    %c0_i32 = arith.constant 0 : i32
    %c0_i32_0 = arith.constant 0 : i32
    return %arg0, %c0_i32 : i32, i32
  }
  func.func @transform_5(%arg0: i32) -> (i32, i32) {
    %c0_i32 = arith.constant 0 : i32
    %c0_i32_0 = arith.constant 0 : i32
    return %arg0, %c0_i32 : i32, i32
  }
}

module attributes {stable_mosaic.version = 11 : i64} {
  func.func @gru_recurrence_kernel(%arg0: i32, %arg1: memref<8x2x32xf32, #tpu.memory_space<vmem>>, %arg2: memref<8x2x32xf32, #tpu.memory_space<vmem>>, %arg3: memref<8x2x32xf32, #tpu.memory_space<vmem>>, %arg4: memref<32x96xf32, #tpu.memory_space<vmem>>, %arg5: memref<1x96xf32, #tpu.memory_space<vmem>>, %arg6: memref<1x2x32xf32, #tpu.memory_space<vmem>>, %arg7: memref<2x32xf32, #tpu.memory_space<vmem>>) attributes {dimension_semantics = [#tpu.dimension_semantics<arbitrary>], iteration_bounds = array<i64: 1>, scalar_prefetch = 0 : i64, scratch_operands = 1 : i64, tpu.core_type = #tpu.core_type<tc>, window_params = [{transform_indices = @transform_0, window_bounds = array<i64: 8, 2, 32>}, {transform_indices = @transform_1, window_bounds = array<i64: 8, 2, 32>}, {transform_indices = @transform_2, window_bounds = array<i64: 8, 2, 32>}, {pipeline_mode = #tpu.pipeline_mode<synchronous>, transform_indices = @transform_3, window_bounds = array<i64: 32, 96>}, {pipeline_mode = #tpu.pipeline_mode<synchronous>, transform_indices = @transform_4, window_bounds = array<i64: 1, 96>}, {pipeline_mode = #tpu.pipeline_mode<synchronous>, transform_indices = @transform_5, window_bounds = array<i64: 1, 2, 32>}]} {
    %c0_i32 = arith.constant 0 : i32
    %0 = arith.cmpi eq, %arg0, %c0_i32 : i32
    %1 = arith.extui %0 : i1 to i32
    %c0_i32_0 = arith.constant 0 : i32
    %2 = arith.cmpi ne, %1, %c0_i32_0 : i32
    scf.if %2 {
      %cst_91 = arith.constant 0.000000e+00 : f32
      %290 = vector.broadcast %cst_91 : f32 to vector<2x32xf32>
      %c0_92 = arith.constant 0 : index
      %c0_93 = arith.constant 0 : index
      %291 = vector.load %arg7[%c0_92, %c0_93] : memref<2x32xf32, #tpu.memory_space<vmem>>, vector<2x32xf32>
      tpu.vector_store %arg7[%c0_92, %c0_93], %290 {strides = array<i32>} : memref<2x32xf32, #tpu.memory_space<vmem>>, vector<2x32xf32>,
    } else {
    }
    %c0 = arith.constant 0 : index
    %c0_1 = arith.constant 0 : index
    %3 = vector.load %arg4[%c0, %c0_1] : memref<32x96xf32, #tpu.memory_space<vmem>>, vector<32x96xf32>
    %c0_2 = arith.constant 0 : index
    %c0_3 = arith.constant 0 : index
    %4 = vector.load %arg5[%c0_2, %c0_3] : memref<1x96xf32, #tpu.memory_space<vmem>>, vector<1x96xf32>
    %c0_4 = arith.constant 0 : index
    %c0_5 = arith.constant 0 : index
    %5 = vector.load %arg7[%c0_4, %c0_5] : memref<2x32xf32, #tpu.memory_space<vmem>>, vector<2x32xf32>
    %c0_i32_6 = arith.constant 0 : i32
    %cst = arith.constant dense<0.000000e+00> : vector<2x96xf32>
    %6 = tpu.matmul %5, %3, %cst {dimension_numbers = #tpu.dot_dimension_numbers<[1], [0], [0], [1], [0, 0, 1, 1], [], []>} : vector<2x32xf32>, vector<32x96xf32>, vector<2x96xf32> -> vector<2x96xf32>
    %7 = vector.broadcast %4 : vector<1x96xf32> to vector<2x96xf32>
    %8 = arith.addf %6, %7 : vector<2x96xf32>
    %9 = arith.index_cast %c0_i32_6 : i32 to index
    %c0_7 = arith.constant 0 : index
    %c0_8 = arith.constant 0 : index
    %10 = vector.load %arg1[%9, %c0_7, %c0_8] : memref<8x2x32xf32, #tpu.memory_space<vmem>>, vector<1x2x32xf32>
    %11 = vector.shape_cast %10 : vector<1x2x32xf32> to vector<2x32xf32>
    %12 = vector.extract_strided_slice %8 {offsets = [0, 0], sizes = [2, 32], strides = [1, 1]} : vector<2x96xf32> to vector<2x32xf32>
    %13 = arith.addf %11, %12 : vector<2x32xf32>
    %14 = arith.negf %13 : vector<2x32xf32>
    %15 = math.exp %14 : vector<2x32xf32>
    %cst_9 = arith.constant 1.000000e+00 : f32
    %16 = vector.broadcast %cst_9 : f32 to vector<2x32xf32>
    %17 = arith.addf %16, %15 : vector<2x32xf32>
    %18 = arith.divf %16, %17 : vector<2x32xf32>
    %19 = arith.index_cast %c0_i32_6 : i32 to index
    %c0_10 = arith.constant 0 : index
    %c0_11 = arith.constant 0 : index
    %20 = vector.load %arg2[%19, %c0_10, %c0_11] : memref<8x2x32xf32, #tpu.memory_space<vmem>>, vector<1x2x32xf32>
    %21 = vector.shape_cast %20 : vector<1x2x32xf32> to vector<2x32xf32>
    %22 = vector.extract_strided_slice %8 {offsets = [0, 32], sizes = [2, 32], strides = [1, 1]} : vector<2x96xf32> to vector<2x32xf32>
    %23 = arith.addf %21, %22 : vector<2x32xf32>
    %24 = arith.negf %23 : vector<2x32xf32>
    %25 = math.exp %24 : vector<2x32xf32>
    %cst_12 = arith.constant 1.000000e+00 : f32
    %26 = vector.broadcast %cst_12 : f32 to vector<2x32xf32>
    %27 = arith.addf %26, %25 : vector<2x32xf32>
    %28 = arith.divf %26, %27 : vector<2x32xf32>
    %29 = arith.index_cast %c0_i32_6 : i32 to index
    %c0_13 = arith.constant 0 : index
    %c0_14 = arith.constant 0 : index
    %30 = vector.load %arg3[%29, %c0_13, %c0_14] : memref<8x2x32xf32, #tpu.memory_space<vmem>>, vector<1x2x32xf32>
    %31 = vector.shape_cast %30 : vector<1x2x32xf32> to vector<2x32xf32>
    %32 = vector.extract_strided_slice %8 {offsets = [0, 64], sizes = [2, 32], strides = [1, 1]} : vector<2x96xf32> to vector<2x32xf32>
    %33 = arith.mulf %18, %32 : vector<2x32xf32>
    %34 = arith.addf %31, %33 : vector<2x32xf32>
    %35 = math.tanh %34 : vector<2x32xf32>
    %cst_15 = arith.constant 1.000000e+00 : f32
    %36 = vector.broadcast %cst_15 : f32 to vector<2x32xf32>
    %37 = arith.subf %36, %28 : vector<2x32xf32>
    %38 = arith.mulf %37, %35 : vector<2x32xf32>
    %39 = arith.mulf %28, %5 : vector<2x32xf32>
    %40 = arith.addf %38, %39 : vector<2x32xf32>
    %c1_i32 = arith.constant 1 : i32
    %cst_16 = arith.constant dense<0.000000e+00> : vector<2x96xf32>
    %41 = tpu.matmul %40, %3, %cst_16 {dimension_numbers = #tpu.dot_dimension_numbers<[1], [0], [0], [1], [0, 0, 1, 1], [], []>} : vector<2x32xf32>, vector<32x96xf32>, vector<2x96xf32> -> vector<2x96xf32>
    %42 = vector.broadcast %4 : vector<1x96xf32> to vector<2x96xf32>
    %43 = arith.addf %41, %42 : vector<2x96xf32>
    %44 = arith.index_cast %c1_i32 : i32 to index
    %c0_17 = arith.constant 0 : index
    %c0_18 = arith.constant 0 : index
    %45 = vector.load %arg1[%44, %c0_17, %c0_18] : memref<8x2x32xf32, #tpu.memory_space<vmem>>, vector<1x2x32xf32>
    %46 = vector.shape_cast %45 : vector<1x2x32xf32> to vector<2x32xf32>
    %47 = vector.extract_strided_slice %43 {offsets = [0, 0], sizes = [2, 32], strides = [1, 1]} : vector<2x96xf32> to vector<2x32xf32>
    %48 = arith.addf %46, %47 : vector<2x32xf32>
    %49 = arith.negf %48 : vector<2x32xf32>
    %50 = math.exp %49 : vector<2x32xf32>
    %cst_19 = arith.constant 1.000000e+00 : f32
    %51 = vector.broadcast %cst_19 : f32 to vector<2x32xf32>
    %52 = arith.addf %51, %50 : vector<2x32xf32>
    %53 = arith.divf %51, %52 : vector<2x32xf32>
    %54 = arith.index_cast %c1_i32 : i32 to index
    %c0_20 = arith.constant 0 : index
    %c0_21 = arith.constant 0 : index
    %55 = vector.load %arg2[%54, %c0_20, %c0_21] : memref<8x2x32xf32, #tpu.memory_space<vmem>>, vector<1x2x32xf32>
    %56 = vector.shape_cast %55 : vector<1x2x32xf32> to vector<2x32xf32>
    %57 = vector.extract_strided_slice %43 {offsets = [0, 32], sizes = [2, 32], strides = [1, 1]} : vector<2x96xf32> to vector<2x32xf32>
    %58 = arith.addf %56, %57 : vector<2x32xf32>
    %59 = arith.negf %58 : vector<2x32xf32>
    %60 = math.exp %59 : vector<2x32xf32>
    %cst_22 = arith.constant 1.000000e+00 : f32
    %61 = vector.broadcast %cst_22 : f32 to vector<2x32xf32>
    %62 = arith.addf %61, %60 : vector<2x32xf32>
    %63 = arith.divf %61, %62 : vector<2x32xf32>
    %64 = arith.index_cast %c1_i32 : i32 to index
    %c0_23 = arith.constant 0 : index
    %c0_24 = arith.constant 0 : index
    %65 = vector.load %arg3[%64, %c0_23, %c0_24] : memref<8x2x32xf32, #tpu.memory_space<vmem>>, vector<1x2x32xf32>
    %66 = vector.shape_cast %65 : vector<1x2x32xf32> to vector<2x32xf32>
    %67 = vector.extract_strided_slice %43 {offsets = [0, 64], sizes = [2, 32], strides = [1, 1]} : vector<2x96xf32> to vector<2x32xf32>
    %68 = arith.mulf %53, %67 : vector<2x32xf32>
    %69 = arith.addf %66, %68 : vector<2x32xf32>
    %70 = math.tanh %69 : vector<2x32xf32>
    %cst_25 = arith.constant 1.000000e+00 : f32
    %71 = vector.broadcast %cst_25 : f32 to vector<2x32xf32>
    %72 = arith.subf %71, %63 : vector<2x32xf32>
    %73 = arith.mulf %72, %70 : vector<2x32xf32>
    %74 = arith.mulf %63, %40 : vector<2x32xf32>
    %75 = arith.addf %73, %74 : vector<2x32xf32>
    %c2_i32 = arith.constant 2 : i32
    %cst_26 = arith.constant dense<0.000000e+00> : vector<2x96xf32>
    %76 = tpu.matmul %75, %3, %cst_26 {dimension_numbers = #tpu.dot_dimension_numbers<[1], [0], [0], [1], [0, 0, 1, 1], [], []>} : vector<2x32xf32>, vector<32x96xf32>, vector<2x96xf32> -> vector<2x96xf32>
    %77 = vector.broadcast %4 : vector<1x96xf32> to vector<2x96xf32>
    %78 = arith.addf %76, %77 : vector<2x96xf32>
    %79 = arith.index_cast %c2_i32 : i32 to index
    %c0_27 = arith.constant 0 : index
    %c0_28 = arith.constant 0 : index
    %80 = vector.load %arg1[%79, %c0_27, %c0_28] : memref<8x2x32xf32, #tpu.memory_space<vmem>>, vector<1x2x32xf32>
    %81 = vector.shape_cast %80 : vector<1x2x32xf32> to vector<2x32xf32>
    %82 = vector.extract_strided_slice %78 {offsets = [0, 0], sizes = [2, 32], strides = [1, 1]} : vector<2x96xf32> to vector<2x32xf32>
    %83 = arith.addf %81, %82 : vector<2x32xf32>
    %84 = arith.negf %83 : vector<2x32xf32>
    %85 = math.exp %84 : vector<2x32xf32>
    %cst_29 = arith.constant 1.000000e+00 : f32
    %86 = vector.broadcast %cst_29 : f32 to vector<2x32xf32>
    %87 = arith.addf %86, %85 : vector<2x32xf32>
    %88 = arith.divf %86, %87 : vector<2x32xf32>
    %89 = arith.index_cast %c2_i32 : i32 to index
    %c0_30 = arith.constant 0 : index
    %c0_31 = arith.constant 0 : index
    %90 = vector.load %arg2[%89, %c0_30, %c0_31] : memref<8x2x32xf32, #tpu.memory_space<vmem>>, vector<1x2x32xf32>
    %91 = vector.shape_cast %90 : vector<1x2x32xf32> to vector<2x32xf32>
    %92 = vector.extract_strided_slice %78 {offsets = [0, 32], sizes = [2, 32], strides = [1, 1]} : vector<2x96xf32> to vector<2x32xf32>
    %93 = arith.addf %91, %92 : vector<2x32xf32>
    %94 = arith.negf %93 : vector<2x32xf32>
    %95 = math.exp %94 : vector<2x32xf32>
    %cst_32 = arith.constant 1.000000e+00 : f32
    %96 = vector.broadcast %cst_32 : f32 to vector<2x32xf32>
    %97 = arith.addf %96, %95 : vector<2x32xf32>
    %98 = arith.divf %96, %97 : vector<2x32xf32>
    %99 = arith.index_cast %c2_i32 : i32 to index
    %c0_33 = arith.constant 0 : index
    %c0_34 = arith.constant 0 : index
    %100 = vector.load %arg3[%99, %c0_33, %c0_34] : memref<8x2x32xf32, #tpu.memory_space<vmem>>, vector<1x2x32xf32>
    %101 = vector.shape_cast %100 : vector<1x2x32xf32> to vector<2x32xf32>
    %102 = vector.extract_strided_slice %78 {offsets = [0, 64], sizes = [2, 32], strides = [1, 1]} : vector<2x96xf32> to vector<2x32xf32>
    %103 = arith.mulf %88, %102 : vector<2x32xf32>
    %104 = arith.addf %101, %103 : vector<2x32xf32>
    %105 = math.tanh %104 : vector<2x32xf32>
    %cst_35 = arith.constant 1.000000e+00 : f32
    %106 = vector.broadcast %cst_35 : f32 to vector<2x32xf32>
    %107 = arith.subf %106, %98 : vector<2x32xf32>
    %108 = arith.mulf %107, %105 : vector<2x32xf32>
    %109 = arith.mulf %98, %75 : vector<2x32xf32>
    %110 = arith.addf %108, %109 : vector<2x32xf32>
    %c3_i32 = arith.constant 3 : i32
    %cst_36 = arith.constant dense<0.000000e+00> : vector<2x96xf32>
    %111 = tpu.matmul %110, %3, %cst_36 {dimension_numbers = #tpu.dot_dimension_numbers<[1], [0], [0], [1], [0, 0, 1, 1], [], []>} : vector<2x32xf32>, vector<32x96xf32>, vector<2x96xf32> -> vector<2x96xf32>
    %112 = vector.broadcast %4 : vector<1x96xf32> to vector<2x96xf32>
    %113 = arith.addf %111, %112 : vector<2x96xf32>
    %114 = arith.index_cast %c3_i32 : i32 to index
    %c0_37 = arith.constant 0 : index
    %c0_38 = arith.constant 0 : index
    %115 = vector.load %arg1[%114, %c0_37, %c0_38] : memref<8x2x32xf32, #tpu.memory_space<vmem>>, vector<1x2x32xf32>
    %116 = vector.shape_cast %115 : vector<1x2x32xf32> to vector<2x32xf32>
    %117 = vector.extract_strided_slice %113 {offsets = [0, 0], sizes = [2, 32], strides = [1, 1]} : vector<2x96xf32> to vector<2x32xf32>
    %118 = arith.addf %116, %117 : vector<2x32xf32>
    %119 = arith.negf %118 : vector<2x32xf32>
    %120 = math.exp %119 : vector<2x32xf32>
    %cst_39 = arith.constant 1.000000e+00 : f32
    %121 = vector.broadcast %cst_39 : f32 to vector<2x32xf32>
    %122 = arith.addf %121, %120 : vector<2x32xf32>
    %123 = arith.divf %121, %122 : vector<2x32xf32>
    %124 = arith.index_cast %c3_i32 : i32 to index
    %c0_40 = arith.constant 0 : index
    %c0_41 = arith.constant 0 : index
    %125 = vector.load %arg2[%124, %c0_40, %c0_41] : memref<8x2x32xf32, #tpu.memory_space<vmem>>, vector<1x2x32xf32>
    %126 = vector.shape_cast %125 : vector<1x2x32xf32> to vector<2x32xf32>
    %127 = vector.extract_strided_slice %113 {offsets = [0, 32], sizes = [2, 32], strides = [1, 1]} : vector<2x96xf32> to vector<2x32xf32>
    %128 = arith.addf %126, %127 : vector<2x32xf32>
    %129 = arith.negf %128 : vector<2x32xf32>
    %130 = math.exp %129 : vector<2x32xf32>
    %cst_42 = arith.constant 1.000000e+00 : f32
    %131 = vector.broadcast %cst_42 : f32 to vector<2x32xf32>
    %132 = arith.addf %131, %130 : vector<2x32xf32>
    %133 = arith.divf %131, %132 : vector<2x32xf32>
    %134 = arith.index_cast %c3_i32 : i32 to index
    %c0_43 = arith.constant 0 : index
    %c0_44 = arith.constant 0 : index
    %135 = vector.load %arg3[%134, %c0_43, %c0_44] : memref<8x2x32xf32, #tpu.memory_space<vmem>>, vector<1x2x32xf32>
    %136 = vector.shape_cast %135 : vector<1x2x32xf32> to vector<2x32xf32>
    %137 = vector.extract_strided_slice %113 {offsets = [0, 64], sizes = [2, 32], strides = [1, 1]} : vector<2x96xf32> to vector<2x32xf32>
    %138 = arith.mulf %123, %137 : vector<2x32xf32>
    %139 = arith.addf %136, %138 : vector<2x32xf32>
    %140 = math.tanh %139 : vector<2x32xf32>
    %cst_45 = arith.constant 1.000000e+00 : f32
    %141 = vector.broadcast %cst_45 : f32 to vector<2x32xf32>
    %142 = arith.subf %141, %133 : vector<2x32xf32>
    %143 = arith.mulf %142, %140 : vector<2x32xf32>
    %144 = arith.mulf %133, %110 : vector<2x32xf32>
    %145 = arith.addf %143, %144 : vector<2x32xf32>
    %c4_i32 = arith.constant 4 : i32
    %cst_46 = arith.constant dense<0.000000e+00> : vector<2x96xf32>
    %146 = tpu.matmul %145, %3, %cst_46 {dimension_numbers = #tpu.dot_dimension_numbers<[1], [0], [0], [1], [0, 0, 1, 1], [], []>} : vector<2x32xf32>, vector<32x96xf32>, vector<2x96xf32> -> vector<2x96xf32>
    %147 = vector.broadcast %4 : vector<1x96xf32> to vector<2x96xf32>
    %148 = arith.addf %146, %147 : vector<2x96xf32>
    %149 = arith.index_cast %c4_i32 : i32 to index
    %c0_47 = arith.constant 0 : index
    %c0_48 = arith.constant 0 : index
    %150 = vector.load %arg1[%149, %c0_47, %c0_48] : memref<8x2x32xf32, #tpu.memory_space<vmem>>, vector<1x2x32xf32>
    %151 = vector.shape_cast %150 : vector<1x2x32xf32> to vector<2x32xf32>
    %152 = vector.extract_strided_slice %148 {offsets = [0, 0], sizes = [2, 32], strides = [1, 1]} : vector<2x96xf32> to vector<2x32xf32>
    %153 = arith.addf %151, %152 : vector<2x32xf32>
    %154 = arith.negf %153 : vector<2x32xf32>
    %155 = math.exp %154 : vector<2x32xf32>
    %cst_49 = arith.constant 1.000000e+00 : f32
    %156 = vector.broadcast %cst_49 : f32 to vector<2x32xf32>
    %157 = arith.addf %156, %155 : vector<2x32xf32>
    %158 = arith.divf %156, %157 : vector<2x32xf32>
    %159 = arith.index_cast %c4_i32 : i32 to index
    %c0_50 = arith.constant 0 : index
    %c0_51 = arith.constant 0 : index
    %160 = vector.load %arg2[%159, %c0_50, %c0_51] : memref<8x2x32xf32, #tpu.memory_space<vmem>>, vector<1x2x32xf32>
    %161 = vector.shape_cast %160 : vector<1x2x32xf32> to vector<2x32xf32>
    %162 = vector.extract_strided_slice %148 {offsets = [0, 32], sizes = [2, 32], strides = [1, 1]} : vector<2x96xf32> to vector<2x32xf32>
    %163 = arith.addf %161, %162 : vector<2x32xf32>
    %164 = arith.negf %163 : vector<2x32xf32>
    %165 = math.exp %164 : vector<2x32xf32>
    %cst_52 = arith.constant 1.000000e+00 : f32
    %166 = vector.broadcast %cst_52 : f32 to vector<2x32xf32>
    %167 = arith.addf %166, %165 : vector<2x32xf32>
    %168 = arith.divf %166, %167 : vector<2x32xf32>
    %169 = arith.index_cast %c4_i32 : i32 to index
    %c0_53 = arith.constant 0 : index
    %c0_54 = arith.constant 0 : index
    %170 = vector.load %arg3[%169, %c0_53, %c0_54] : memref<8x2x32xf32, #tpu.memory_space<vmem>>, vector<1x2x32xf32>
    %171 = vector.shape_cast %170 : vector<1x2x32xf32> to vector<2x32xf32>
    %172 = vector.extract_strided_slice %148 {offsets = [0, 64], sizes = [2, 32], strides = [1, 1]} : vector<2x96xf32> to vector<2x32xf32>
    %173 = arith.mulf %158, %172 : vector<2x32xf32>
    %174 = arith.addf %171, %173 : vector<2x32xf32>
    %175 = math.tanh %174 : vector<2x32xf32>
    %cst_55 = arith.constant 1.000000e+00 : f32
    %176 = vector.broadcast %cst_55 : f32 to vector<2x32xf32>
    %177 = arith.subf %176, %168 : vector<2x32xf32>
    %178 = arith.mulf %177, %175 : vector<2x32xf32>
    %179 = arith.mulf %168, %145 : vector<2x32xf32>
    %180 = arith.addf %178, %179 : vector<2x32xf32>
    %c5_i32 = arith.constant 5 : i32
    %cst_56 = arith.constant dense<0.000000e+00> : vector<2x96xf32>
    %181 = tpu.matmul %180, %3, %cst_56 {dimension_numbers = #tpu.dot_dimension_numbers<[1], [0], [0], [1], [0, 0, 1, 1], [], []>} : vector<2x32xf32>, vector<32x96xf32>, vector<2x96xf32> -> vector<2x96xf32>
    %182 = vector.broadcast %4 : vector<1x96xf32> to vector<2x96xf32>
    %183 = arith.addf %181, %182 : vector<2x96xf32>
    %184 = arith.index_cast %c5_i32 : i32 to index
    %c0_57 = arith.constant 0 : index
    %c0_58 = arith.constant 0 : index
    %185 = vector.load %arg1[%184, %c0_57, %c0_58] : memref<8x2x32xf32, #tpu.memory_space<vmem>>, vector<1x2x32xf32>
    %186 = vector.shape_cast %185 : vector<1x2x32xf32> to vector<2x32xf32>
    %187 = vector.extract_strided_slice %183 {offsets = [0, 0], sizes = [2, 32], strides = [1, 1]} : vector<2x96xf32> to vector<2x32xf32>
    %188 = arith.addf %186, %187 : vector<2x32xf32>
    %189 = arith.negf %188 : vector<2x32xf32>
    %190 = math.exp %189 : vector<2x32xf32>
    %cst_59 = arith.constant 1.000000e+00 : f32
    %191 = vector.broadcast %cst_59 : f32 to vector<2x32xf32>
    %192 = arith.addf %191, %190 : vector<2x32xf32>
    %193 = arith.divf %191, %192 : vector<2x32xf32>
    %194 = arith.index_cast %c5_i32 : i32 to index
    %c0_60 = arith.constant 0 : index
    %c0_61 = arith.constant 0 : index
    %195 = vector.load %arg2[%194, %c0_60, %c0_61] : memref<8x2x32xf32, #tpu.memory_space<vmem>>, vector<1x2x32xf32>
    %196 = vector.shape_cast %195 : vector<1x2x32xf32> to vector<2x32xf32>
    %197 = vector.extract_strided_slice %183 {offsets = [0, 32], sizes = [2, 32], strides = [1, 1]} : vector<2x96xf32> to vector<2x32xf32>
    %198 = arith.addf %196, %197 : vector<2x32xf32>
    %199 = arith.negf %198 : vector<2x32xf32>
    %200 = math.exp %199 : vector<2x32xf32>
    %cst_62 = arith.constant 1.000000e+00 : f32
    %201 = vector.broadcast %cst_62 : f32 to vector<2x32xf32>
    %202 = arith.addf %201, %200 : vector<2x32xf32>
    %203 = arith.divf %201, %202 : vector<2x32xf32>
    %204 = arith.index_cast %c5_i32 : i32 to index
    %c0_63 = arith.constant 0 : index
    %c0_64 = arith.constant 0 : index
    %205 = vector.load %arg3[%204, %c0_63, %c0_64] : memref<8x2x32xf32, #tpu.memory_space<vmem>>, vector<1x2x32xf32>
    %206 = vector.shape_cast %205 : vector<1x2x32xf32> to vector<2x32xf32>
    %207 = vector.extract_strided_slice %183 {offsets = [0, 64], sizes = [2, 32], strides = [1, 1]} : vector<2x96xf32> to vector<2x32xf32>
    %208 = arith.mulf %193, %207 : vector<2x32xf32>
    %209 = arith.addf %206, %208 : vector<2x32xf32>
    %210 = math.tanh %209 : vector<2x32xf32>
    %cst_65 = arith.constant 1.000000e+00 : f32
    %211 = vector.broadcast %cst_65 : f32 to vector<2x32xf32>
    %212 = arith.subf %211, %203 : vector<2x32xf32>
    %213 = arith.mulf %212, %210 : vector<2x32xf32>
    %214 = arith.mulf %203, %180 : vector<2x32xf32>
    %215 = arith.addf %213, %214 : vector<2x32xf32>
    %c6_i32 = arith.constant 6 : i32
    %cst_66 = arith.constant dense<0.000000e+00> : vector<2x96xf32>
    %216 = tpu.matmul %215, %3, %cst_66 {dimension_numbers = #tpu.dot_dimension_numbers<[1], [0], [0], [1], [0, 0, 1, 1], [], []>} : vector<2x32xf32>, vector<32x96xf32>, vector<2x96xf32> -> vector<2x96xf32>
    %217 = vector.broadcast %4 : vector<1x96xf32> to vector<2x96xf32>
    %218 = arith.addf %216, %217 : vector<2x96xf32>
    %219 = arith.index_cast %c6_i32 : i32 to index
    %c0_67 = arith.constant 0 : index
    %c0_68 = arith.constant 0 : index
    %220 = vector.load %arg1[%219, %c0_67, %c0_68] : memref<8x2x32xf32, #tpu.memory_space<vmem>>, vector<1x2x32xf32>
    %221 = vector.shape_cast %220 : vector<1x2x32xf32> to vector<2x32xf32>
    %222 = vector.extract_strided_slice %218 {offsets = [0, 0], sizes = [2, 32], strides = [1, 1]} : vector<2x96xf32> to vector<2x32xf32>
    %223 = arith.addf %221, %222 : vector<2x32xf32>
    %224 = arith.negf %223 : vector<2x32xf32>
    %225 = math.exp %224 : vector<2x32xf32>
    %cst_69 = arith.constant 1.000000e+00 : f32
    %226 = vector.broadcast %cst_69 : f32 to vector<2x32xf32>
    %227 = arith.addf %226, %225 : vector<2x32xf32>
    %228 = arith.divf %226, %227 : vector<2x32xf32>
    %229 = arith.index_cast %c6_i32 : i32 to index
    %c0_70 = arith.constant 0 : index
    %c0_71 = arith.constant 0 : index
    %230 = vector.load %arg2[%229, %c0_70, %c0_71] : memref<8x2x32xf32, #tpu.memory_space<vmem>>, vector<1x2x32xf32>
    %231 = vector.shape_cast %230 : vector<1x2x32xf32> to vector<2x32xf32>
    %232 = vector.extract_strided_slice %218 {offsets = [0, 32], sizes = [2, 32], strides = [1, 1]} : vector<2x96xf32> to vector<2x32xf32>
    %233 = arith.addf %231, %232 : vector<2x32xf32>
    %234 = arith.negf %233 : vector<2x32xf32>
    %235 = math.exp %234 : vector<2x32xf32>
    %cst_72 = arith.constant 1.000000e+00 : f32
    %236 = vector.broadcast %cst_72 : f32 to vector<2x32xf32>
    %237 = arith.addf %236, %235 : vector<2x32xf32>
    %238 = arith.divf %236, %237 : vector<2x32xf32>
    %239 = arith.index_cast %c6_i32 : i32 to index
    %c0_73 = arith.constant 0 : index
    %c0_74 = arith.constant 0 : index
    %240 = vector.load %arg3[%239, %c0_73, %c0_74] : memref<8x2x32xf32, #tpu.memory_space<vmem>>, vector<1x2x32xf32>
    %241 = vector.shape_cast %240 : vector<1x2x32xf32> to vector<2x32xf32>
    %242 = vector.extract_strided_slice %218 {offsets = [0, 64], sizes = [2, 32], strides = [1, 1]} : vector<2x96xf32> to vector<2x32xf32>
    %243 = arith.mulf %228, %242 : vector<2x32xf32>
    %244 = arith.addf %241, %243 : vector<2x32xf32>
    %245 = math.tanh %244 : vector<2x32xf32>
    %cst_75 = arith.constant 1.000000e+00 : f32
    %246 = vector.broadcast %cst_75 : f32 to vector<2x32xf32>
    %247 = arith.subf %246, %238 : vector<2x32xf32>
    %248 = arith.mulf %247, %245 : vector<2x32xf32>
    %249 = arith.mulf %238, %215 : vector<2x32xf32>
    %250 = arith.addf %248, %249 : vector<2x32xf32>
    %c7_i32 = arith.constant 7 : i32
    %cst_76 = arith.constant dense<0.000000e+00> : vector<2x96xf32>
    %251 = tpu.matmul %250, %3, %cst_76 {dimension_numbers = #tpu.dot_dimension_numbers<[1], [0], [0], [1], [0, 0, 1, 1], [], []>} : vector<2x32xf32>, vector<32x96xf32>, vector<2x96xf32> -> vector<2x96xf32>
    %252 = vector.broadcast %4 : vector<1x96xf32> to vector<2x96xf32>
    %253 = arith.addf %251, %252 : vector<2x96xf32>
    %254 = arith.index_cast %c7_i32 : i32 to index
    %c0_77 = arith.constant 0 : index
    %c0_78 = arith.constant 0 : index
    %255 = vector.load %arg1[%254, %c0_77, %c0_78] : memref<8x2x32xf32, #tpu.memory_space<vmem>>, vector<1x2x32xf32>
    %256 = vector.shape_cast %255 : vector<1x2x32xf32> to vector<2x32xf32>
    %257 = vector.extract_strided_slice %253 {offsets = [0, 0], sizes = [2, 32], strides = [1, 1]} : vector<2x96xf32> to vector<2x32xf32>
    %258 = arith.addf %256, %257 : vector<2x32xf32>
    %259 = arith.negf %258 : vector<2x32xf32>
    %260 = math.exp %259 : vector<2x32xf32>
    %cst_79 = arith.constant 1.000000e+00 : f32
    %261 = vector.broadcast %cst_79 : f32 to vector<2x32xf32>
    %262 = arith.addf %261, %260 : vector<2x32xf32>
    %263 = arith.divf %261, %262 : vector<2x32xf32>
    %264 = arith.index_cast %c7_i32 : i32 to index
    %c0_80 = arith.constant 0 : index
    %c0_81 = arith.constant 0 : index
    %265 = vector.load %arg2[%264, %c0_80, %c0_81] : memref<8x2x32xf32, #tpu.memory_space<vmem>>, vector<1x2x32xf32>
    %266 = vector.shape_cast %265 : vector<1x2x32xf32> to vector<2x32xf32>
    %267 = vector.extract_strided_slice %253 {offsets = [0, 32], sizes = [2, 32], strides = [1, 1]} : vector<2x96xf32> to vector<2x32xf32>
    %268 = arith.addf %266, %267 : vector<2x32xf32>
    %269 = arith.negf %268 : vector<2x32xf32>
    %270 = math.exp %269 : vector<2x32xf32>
    %cst_82 = arith.constant 1.000000e+00 : f32
    %271 = vector.broadcast %cst_82 : f32 to vector<2x32xf32>
    %272 = arith.addf %271, %270 : vector<2x32xf32>
    %273 = arith.divf %271, %272 : vector<2x32xf32>
    %274 = arith.index_cast %c7_i32 : i32 to index
    %c0_83 = arith.constant 0 : index
    %c0_84 = arith.constant 0 : index
    %275 = vector.load %arg3[%274, %c0_83, %c0_84] : memref<8x2x32xf32, #tpu.memory_space<vmem>>, vector<1x2x32xf32>
    %276 = vector.shape_cast %275 : vector<1x2x32xf32> to vector<2x32xf32>
    %277 = vector.extract_strided_slice %253 {offsets = [0, 64], sizes = [2, 32], strides = [1, 1]} : vector<2x96xf32> to vector<2x32xf32>
    %278 = arith.mulf %263, %277 : vector<2x32xf32>
    %279 = arith.addf %276, %278 : vector<2x32xf32>
    %280 = math.tanh %279 : vector<2x32xf32>
    %cst_85 = arith.constant 1.000000e+00 : f32
    %281 = vector.broadcast %cst_85 : f32 to vector<2x32xf32>
    %282 = arith.subf %281, %273 : vector<2x32xf32>
    %283 = arith.mulf %282, %280 : vector<2x32xf32>
    %284 = arith.mulf %273, %250 : vector<2x32xf32>
    %285 = arith.addf %283, %284 : vector<2x32xf32>
    %c8_i32 = arith.constant 8 : i32
    %c0_86 = arith.constant 0 : index
    %c0_87 = arith.constant 0 : index
    %286 = vector.load %arg7[%c0_86, %c0_87] : memref<2x32xf32, #tpu.memory_space<vmem>>, vector<2x32xf32>
    tpu.vector_store %arg7[%c0_86, %c0_87], %285 {strides = array<i32>} : memref<2x32xf32, #tpu.memory_space<vmem>>, vector<2x32xf32>,
    %c0_88 = arith.constant 0 : index
    %c0_89 = arith.constant 0 : index
    %c0_90 = arith.constant 0 : index
    %287 = vector.load %arg6[%c0_88, %c0_89, %c0_90] : memref<1x2x32xf32, #tpu.memory_space<vmem>>, vector<1x2x32xf32>
    %288 = vector.shape_cast %287 : vector<1x2x32xf32> to vector<2x32xf32>
    %289 = vector.shape_cast %285 : vector<2x32xf32> to vector<1x2x32xf32>
    tpu.vector_store %arg6[%c0_88, %c0_89, %c0_90], %289 {strides = array<i32>} : memref<1x2x32xf32, #tpu.memory_space<vmem>>, vector<1x2x32xf32>,
    return
  }
  func.func @transform_0(%arg0: i32) -> (i32, i32, i32) {
    %c0_i32 = arith.constant 0 : i32
    %c0_i32_0 = arith.constant 0 : i32
    %c0_i32_1 = arith.constant 0 : i32
    return %arg0, %c0_i32, %c0_i32_0 : i32, i32, i32
  }
  func.func @transform_1(%arg0: i32) -> (i32, i32, i32) {
    %c0_i32 = arith.constant 0 : i32
    %c0_i32_0 = arith.constant 0 : i32
    %c0_i32_1 = arith.constant 0 : i32
    return %arg0, %c0_i32, %c0_i32_0 : i32, i32, i32
  }
  func.func @transform_2(%arg0: i32) -> (i32, i32, i32) {
    %c0_i32 = arith.constant 0 : i32
    %c0_i32_0 = arith.constant 0 : i32
    %c0_i32_1 = arith.constant 0 : i32
    return %arg0, %c0_i32, %c0_i32_0 : i32, i32, i32
  }
  func.func @transform_3(%arg0: i32) -> (i32, i32) {
    %c0_i32 = arith.constant 0 : i32
    %c0_i32_0 = arith.constant 0 : i32
    %c0_i32_1 = arith.constant 0 : i32
    return %c0_i32, %c0_i32_0 : i32, i32
  }
  func.func @transform_4(%arg0: i32) -> (i32, i32) {
    %c0_i32 = arith.constant 0 : i32
    %c0_i32_0 = arith.constant 0 : i32
    %c0_i32_1 = arith.constant 0 : i32
    return %c0_i32, %c0_i32_0 : i32, i32
  }
  func.func @transform_5(%arg0: i32) -> (i32, i32, i32) {
    %c0_i32 = arith.constant 0 : i32
    %c0_i32_0 = arith.constant 0 : i32
    %c0_i32_1 = arith.constant 0 : i32
    %c0_i32_2 = arith.constant 0 : i32
    return %c0_i32, %c0_i32_0, %c0_i32_1 : i32, i32, i32
  }
}

</mosaic_0001>

<bundles_post_ra>
// kernel: encoder_forward.2
= control target key start
LH: loop header
LB: loop body
LE: loop exit
PB: predicated region body
PF: predicated region fallthrough
CT: control target
= control target key end

     0   :  { %vm30_vm0 = vcmask 261120   ;;  %s175_s10 = smov 96   ;;  %s253_s1 = inlined_call_operand.vmem [shape: f32[32,96], index: 1, kind: input, shape index: {}]   ;;  %s254_s0 = inlined_call_operand.vmem [shape: f32[16,32], index: 0, kind: input, shape index: {}]   ;;  %s255_s2 = inlined_call_operand.vmem [shape: f32[1,96], index: 2, kind: input, shape index: {}]   ;;  %s256_s3 = inlined_call_operand.vmem [shape: f32[16,32], index: 3, kind: output, shape index: {0}]   ;;  %s257_s5 = inlined_call_operand.vmem [shape: f32[16,32], index: 5, kind: output, shape index: {2}]   ;;  %s258_s4 = inlined_call_operand.vmem [shape: f32[16,32], index: 4, kind: output, shape index: {1}]  }
   0x1   :  { %v19_v0 = vld [vmem:[%s253_s1] sm:$0xff]  ;;  %v20_v1 = vld [vmem:[%s253_s1 + $0x8] sm:$0xff]  ;;  %v21_v2 = vld [vmem:[%s253_s1 + $0x10] sm:$0xff] }
   0x2   :  { %v164_v3 = vpack.c.bf16 %v20_v1, %v19_v0  ;;  %v22_v4 = vld [vmem:[%s253_s1 + $0x18] sm:$0xff]  ;;  %v17_v5 = vld [vmem:[%s254_s0] sm:$0xff]  ;;  %v18_v7 = vld [vmem:[%s254_s0 + $0x8] sm:$0xff]  ;;  %s174_s0 = smov 64  }
   0x3   :  { %v168_v6 = vpack.c.bf16 %v22_v4, %v21_v2  ;;  %161 = vmatprep.mubr.msk.f32.mxu0 %vm30_vm0, %v17_v5  ;;  %v144_v8 = vld [vmem:[%s255_s2] ss:$0 sm:$0xff] }
   0x4   :  { %165 = vmatprep.subr.bf16.mxu0 %v164_v3 }
   0x5   :  { %167 = vmatpush3.bf16.msra.mxu0 %v164_v3 }
   0x6   :  { %169 = vmatprep.subr.bf16.mxu0 %v168_v6 }
   0x9   :  { %171 = vmatpush3.bf16.msra.mxu0 %v168_v6 }
   0xc   :  { %162 = vmatmul.mubr.msk.f32.vlgmr.msra.gmra.mrb[0].mxu0 %vm30_vm0, %v18_v7 }
  0xdf   :  { %v163_v9 = vpop.f32.mrb[0].mxu0 }
  0xe0   :  { %v109_v10 = vadd.f32 %v163_v9, %v144_v8  ;;  %v103_v11 = vpop.f32.mrb[1].mxu0 }
  0xe1   :  { %v104_v12 = vadd.f32 %v144_v8, %v103_v11 }
  0xe2   :  { %113 = vst.msk [vmem:[%s256_s3 + $0x8] sm:$0xff] %vm30_vm0, %v109_v10 }
  0xe3   :  { %112 = vst.msk [vmem:[%s256_s3] sm:$0xff] %vm30_vm0, %v104_v12  ;;  %124 = vrot.lane.b32.xlu1 %v104_v12, %s174_s0  ;;  %116 = vrot.lane.b32.xlu0 %v104_v12, %s175_s10 }
  0xe7   :  { %126 = vrot.lane.b32.xlu1 %v109_v10, %s174_s0  ;;  %118 = vrot.lane.b32.xlu0 %v109_v10, %s175_s10 }
 0x155   :  { %v125_v13 = vpop.permute.xlu1 %124  ;;  %v117_v14 = vpop.permute.xlu0 %116 }
 0x156   :  { %130 = vst.msk [vmem:[%s257_s5] sm:$0xff] %vm30_vm0, %v125_v13  ;;  %122 = vst.msk [vmem:[%s258_s4] sm:$0xff] %vm30_vm0, %v117_v14 }
 0x159   :  { %v127_v15 = vpop.permute.xlu1 %126  ;;  %v119_v16 = vpop.permute.xlu0 %118 }
 0x15a   :  { %131 = vst.msk [vmem:[%s257_s5 + $0x8] sm:$0xff] %vm30_vm0, %v127_v15  ;;  %123 = vst.msk [vmem:[%s258_s4 + $0x8] sm:$0xff] %vm30_vm0, %v119_v16 }

// kernel: encoder_forward.3
= control target key start
LH: loop header
LB: loop body
LE: loop exit
PB: predicated region body
PF: predicated region fallthrough
CT: control target
= control target key end

     0   :  { %v1242_v3 = vmov 0.0|0.0   ;;  %vm1243_vm0 = vmmov 0   ;;  %v1244_v6 = vmov 0.0   ;;  %vm25_vm1 = vcmask 254976   ;;  %s1467_s0 = inlined_call_operand.vmem [shape: f32[8,2,32], index: 0, kind: input, shape index: {}]   ;;  %s1468_s1 = inlined_call_operand.vmem [shape: f32[8,2,32], index: 1, kind: input, shape index: {}]   ;;  %s1469_s2 = inlined_call_operand.vmem [shape: f32[8,2,32], index: 2, kind: input, shape index: {}]   ;;  %s1470_s3 = inlined_call_operand.vmem [shape: f32[32,96], index: 3, kind: input, shape index: {}]   ;;  %s1471_s4 = inlined_call_operand.vmem [shape: f32[1,96], index: 4, kind: input, shape index: {}]   ;;  %s1472_s5 = inlined_call_operand.hbm [shape: f32[1,2,32], index: 5, kind: output, shape index: {}]  }
   0x1   :  { %v27_v0 = vld [vmem:[%s1470_s3] sm:$0xff]  ;;  %v28_v1 = vld [vmem:[%s1470_s3 + $0x8] sm:$0xff]  ;;  %v29_v2 = vld [vmem:[%s1470_s3 + $0x10] sm:$0xff]  ;;  %1084 = vmatprep.subr.bf16.mxu0 %v1242_v3  ;;  %1004 = vmatprep.mubr.msk.f32.mxu0 %vm1243_vm0, %v1244_v6  ;;  %26 = vst.msk [vmem:[#allocation2] sm:$0x3] %vm25_vm1, %v1244_v6 }
   0x2   :  { %v1288_v4 = vpack.c.bf16 %v28_v1, %v27_v0  ;;  %v30_v5 = vld [vmem:[%s1470_s3 + $0x18] sm:$0xff]  ;;  %1090 = vmatprep.subr.bf16.mxu1 %v1242_v3  ;;  %1015 = vmatprep.mubr.msk.f32.mxu1 %vm1243_vm0, %v1244_v6 }
   0x3   :  { %10 = vsyncpa [#allocation4], 0  ;;  %v1301_v7 = vpack.c.bf16 %v30_v5, %v29_v2  ;;  %vm39_vm2 = vcmask 261120   ;;  %v1320_v9 = vld [vmem:[%s1471_s4] ss:$0 sm:$0xff]  ;;  %s1245_s27 = smov 96  }
   0x4   :  { %1086 = vmatpush3.bf16.msra.mxu0 %v1288_v4  ;;  %1092 = vmatpush3.bf16.msra.mxu1 %v1288_v4  ;;  %s1246_s28 = smov 64   ;;  %v113_v13 = vld [vmem:[%s1467_s0] sm:$0x3]  ;;  %v915_v38 = vld [vmem:[%s1467_s0 + $0x2] sm:$0x3] }
   0x5   :  { %1087 = vmatprep.subr.bf16.mxu0 %v1242_v3  ;;  %1093 = vmatprep.subr.bf16.mxu1 %v1242_v3  ;;  %v121_v18 = vld [vmem:[%s1468_s1] sm:$0x3]  ;;  %v917_v43 = vld [vmem:[%s1468_s1 + $0x2] sm:$0x3]  ;;  %v921_v63 = vld [vmem:[%s1467_s0 + $0x4] sm:$0x3] }
   0x6   :  { %v133_v25 = vld [vmem:[%s1469_s2] sm:$0x3]  ;;  %v919_v50 = vld [vmem:[%s1469_s2 + $0x2] sm:$0x3] }
   0x8   :  { %1089 = vmatpush3.bf16.msra.mxu0 %v1301_v7  ;;  %1095 = vmatpush3.bf16.msra.mxu1 %v1301_v7  ;;  %v32_v8 = vld [vmem:[#allocation2] sm:$0x3] }
   0x9   :  { %1096 = vmatprep.subr.bf16.mxu0 %v1242_v3  ;;  %1102 = vmatprep.subr.bf16.mxu1 %v1242_v3 }
   0xb   :  { %1005 = vmatmul.mubr.msk.f32.vlgmr.msra.gmra.mrb[0].mxu0 %vm39_vm2, %v32_v8 }
   0xc   :  { %1098 = vmatpush3.bf16.msra.mxu0 %v1288_v4  ;;  %1026 = vmatprep.mubr.msk.f32.mxu0 %vm1243_vm0, %v1244_v6 }
   0xd   :  { %1099 = vmatprep.subr.bf16.mxu0 %v1242_v3 }
  0x10   :  { %1101 = vmatpush3.bf16.msra.mxu0 %v1301_v7 }
  0x11   :  { %1108 = vmatprep.subr.bf16.mxu0 %v1242_v3 }
  0xde   :  { %v109_v10 = vpop.f32.mrb[0].mxu0 }
  0xdf   :  { %v110_v11 = vadd.f32 %v1320_v9, %v109_v10  ;;  %v1006_v12 = vpop.f32.mrb[1].mxu0 }
  0xe1   :  { %123 = vrot.lane.b32.xlu0 %v110_v11, %s1245_s27  ;;  %v114_v14 = vadd.f32 %v113_v13, %v110_v11 }
  0xe3   :  { %v912_v15 = vmul.f32 -1.442695, %v114_v14 }
  0xe5   :  { %134 = vrot.lane.b32.xlu0 %v110_v11, %s1246_s28  ;;  %1138 = vpow2.f32 %v912_v15 }
  0xef   :  { %v1139_v16 = vpop.eup %1138 }
  0xf0   :  { %v118_v17 = vadd.f32 1.0, %v1139_v16  ;;  %v925_v16 = vld [vmem:[%s1469_s2 + $0x4] sm:$0x3] }
  0xf2   :  { %1140 = vrcp.f32 %v118_v17 }
  0xfc   :  { %v1141_v23 = vpop.eup %1140 }
 0x153   :  { %v124_v19 = vpop.permute.xlu0 %123 }
 0x154   :  { %v126_v20 = vadd.f32 %v124_v19, %v121_v18 }
 0x156   :  { %v913_v21 = vmul.f32 -1.442695, %v126_v20 }
 0x157   :  { %v135_v22 = vpop.permute.xlu0 %134 }
 0x158   :  { %1142 = vpow2.f32 %v913_v21  ;;  %v137_v24 = vmul.f32 %v1141_v23, %v135_v22 }
 0x15a   :  { %v138_v28 = vadd.f32 %v137_v24, %v133_v25 }
 0x162   :  { %v1143_v26 = vpop.eup %1142 }
 0x163   :  { %v130_v27 = vadd.f32 1.0, %v1143_v26 }
 0x165   :  { %1144 = vrcp.f32 %v130_v27 }
 0x166   :  { %1146 = vtanh.f32 %v138_v28 }
 0x16f   :  { %v1145_v29 = vpop.eup %1144 }
 0x170   :  { %v140_v30 = vsub.f32 1.0, %v1145_v29  ;;  %v1147_v31 = vpop.eup %1146  ;;  %v142_v33 = vmul.f32 %v1145_v29, %v32_v8  ;;  %v923_v8 = vld [vmem:[%s1468_s1 + $0x4] sm:$0x3]  ;;  %v927_v29 = vld [vmem:[%s1467_s0 + $0x6] sm:$0x3] }
 0x172   :  { %v141_v32 = vmul.f32 %v1147_v31, %v140_v30 }
 0x174   :  { %v143_v34 = vadd.f32 %v142_v33, %v141_v32 }
 0x176   :  { %1016 = vmatmul.mubr.msk.f32.vlgmr.msra.gmra.mrb[0].mxu1 %vm39_vm2, %v143_v34 }
 0x177   :  { %1104 = vmatpush3.bf16.msra.mxu1 %v1288_v4  ;;  %1037 = vmatprep.mubr.msk.f32.mxu1 %vm1243_vm0, %v1244_v6 }
 0x178   :  { %1105 = vmatprep.subr.bf16.mxu1 %v1242_v3 }
 0x17b   :  { %1107 = vmatpush3.bf16.msra.mxu1 %v1301_v7 }
 0x17c   :  { %1114 = vmatprep.subr.bf16.mxu1 %v1242_v3 }
 0x249   :  { %v213_v35 = vpop.f32.mrb[0].mxu1 }
 0x24a   :  { %v214_v36 = vadd.f32 %v1320_v9, %v213_v35  ;;  %v1017_v37 = vpop.f32.mrb[1].mxu1 }
 0x24c   :  { %229 = vrot.lane.b32.xlu1 %v214_v36, %s1245_s27  ;;  %v219_v39 = vadd.f32 %v915_v38, %v214_v36 }
 0x24e   :  { %v916_v40 = vmul.f32 -1.442695, %v219_v39 }
 0x250   :  { %241 = vrot.lane.b32.xlu1 %v214_v36, %s1246_s28  ;;  %1148 = vpow2.f32 %v916_v40 }
 0x25a   :  { %v1149_v41 = vpop.eup %1148 }
 0x25b   :  { %v223_v42 = vadd.f32 1.0, %v1149_v41  ;;  %v931_v41 = vld [vmem:[%s1469_s2 + $0x6] sm:$0x3] }
 0x25d   :  { %1150 = vrcp.f32 %v223_v42 }
 0x267   :  { %v1151_v48 = vpop.eup %1150 }
 0x2be   :  { %v230_v44 = vpop.permute.xlu1 %229 }
 0x2bf   :  { %v232_v45 = vadd.f32 %v917_v43, %v230_v44 }
 0x2c1   :  { %v918_v46 = vmul.f32 -1.442695, %v232_v45 }
 0x2c2   :  { %v242_v47 = vpop.permute.xlu1 %241 }
 0x2c3   :  { %1152 = vpow2.f32 %v918_v46  ;;  %v244_v49 = vmul.f32 %v1151_v48, %v242_v47 }
 0x2c5   :  { %v245_v53 = vadd.f32 %v919_v50, %v244_v49 }
 0x2cd   :  { %v1153_v51 = vpop.eup %1152 }
 0x2ce   :  { %v236_v52 = vadd.f32 1.0, %v1153_v51 }
 0x2d0   :  { %1154 = vrcp.f32 %v236_v52 }
 0x2d1   :  { %1156 = vtanh.f32 %v245_v53 }
 0x2da   :  { %v1155_v54 = vpop.eup %1154 }
 0x2db   :  { %v247_v55 = vsub.f32 1.0, %v1155_v54  ;;  %v1157_v56 = vpop.eup %1156  ;;  %v249_v58 = vmul.f32 %v1155_v54, %v143_v34  ;;  %v929_v34 = vld [vmem:[%s1468_s1 + $0x6] sm:$0x3]  ;;  %v933_v54 = vld [vmem:[%s1467_s0 + $0x8] sm:$0x3] }
 0x2dd   :  { %v248_v57 = vmul.f32 %v1157_v56, %v247_v55 }
 0x2df   :  { %v250_v59 = vadd.f32 %v249_v58, %v248_v57 }
 0x2e1   :  { %1027 = vmatmul.mubr.msk.f32.vlgmr.msra.gmra.mrb[2].mxu0 %vm39_vm2, %v250_v59 }
 0x2e2   :  { %1110 = vmatpush3.bf16.msra.mxu0 %v1288_v4  ;;  %1048 = vmatprep.mubr.msk.f32.mxu0 %vm1243_vm0, %v1244_v6 }
 0x2e3   :  { %1111 = vmatprep.subr.bf16.mxu0 %v1242_v3 }
 0x2e6   :  { %1113 = vmatpush3.bf16.msra.mxu0 %v1301_v7 }
 0x2e7   :  { %1120 = vmatprep.subr.bf16.mxu0 %v1242_v3 }
 0x3b4   :  { %v320_v60 = vpop.f32.mrb[2].mxu0 }
 0x3b5   :  { %v321_v61 = vadd.f32 %v1320_v9, %v320_v60  ;;  %v1028_v62 = vpop.f32.mrb[3].mxu0 }
 0x3b7   :  { %348 = vrot.lane.b32.xlu1 %v321_v61, %s1246_s28  ;;  %336 = vrot.lane.b32.xlu0 %v321_v61, %s1245_s27  ;;  %v326_v0 = vadd.f32 %v921_v63, %v321_v61 }
 0x3b9   :  { %v922_v1 = vmul.f32 -1.442695, %v326_v0 }
 0x3bb   :  { %1158 = vpow2.f32 %v922_v1 }
 0x3c5   :  { %v1159_v2 = vpop.eup %1158 }
 0x3c6   :  { %v330_v5 = vadd.f32 1.0, %v1159_v2  ;;  %v937_v2 = vld [vmem:[%s1469_s2 + $0x8] sm:$0x3] }
 0x3c8   :  { %1160 = vrcp.f32 %v330_v5 }
 0x3d2   :  { %v1161_v14 = vpop.eup %1160 }
 0x429   :  { %v337_v10 = vpop.permute.xlu0 %336  ;;  %v349_v13 = vpop.permute.xlu1 %348 }
 0x42a   :  { %v339_v11 = vadd.f32 %v923_v8, %v337_v10  ;;  %v351_v15 = vmul.f32 %v1161_v14, %v349_v13 }
 0x42c   :  { %v924_v12 = vmul.f32 -1.442695, %v339_v11  ;;  %v352_v18 = vadd.f32 %v925_v16, %v351_v15 }
 0x42e   :  { %1162 = vpow2.f32 %v924_v12 }
 0x438   :  { %v1163_v17 = vpop.eup %1162 }
 0x439   :  { %v343_v19 = vadd.f32 1.0, %v1163_v17 }
 0x43b   :  { %1164 = vrcp.f32 %v343_v19 }
 0x43c   :  { %1166 = vtanh.f32 %v352_v18 }
 0x445   :  { %v1165_v20 = vpop.eup %1164 }
 0x446   :  { %v354_v21 = vsub.f32 1.0, %v1165_v20  ;;  %v1167_v22 = vpop.eup %1166  ;;  %v356_v24 = vmul.f32 %v1165_v20, %v250_v59  ;;  %v935_v59 = vld [vmem:[%s1468_s1 + $0x8] sm:$0x3]  ;;  %v939_v20 = vld [vmem:[%s1467_s0 + $0xa] sm:$0x3] }
 0x448   :  { %v355_v23 = vmul.f32 %v1167_v22, %v354_v21 }
 0x44a   :  { %v357_v25 = vadd.f32 %v356_v24, %v355_v23 }
 0x44c   :  { %1038 = vmatmul.mubr.msk.f32.vlgmr.msra.gmra.mrb[2].mxu1 %vm39_vm2, %v357_v25 }
 0x44d   :  { %1116 = vmatpush3.bf16.msra.mxu1 %v1288_v4  ;;  %1059 = vmatprep.mubr.msk.f32.mxu1 %vm1243_vm0, %v1244_v6 }
 0x44e   :  { %1117 = vmatprep.subr.bf16.mxu1 %v1242_v3 }
 0x451   :  { %1119 = vmatpush3.bf16.msra.mxu1 %v1301_v7 }
 0x452   :  { %1126 = vmatprep.subr.bf16.mxu1 %v1242_v3 }
 0x51f   :  { %v427_v26 = vpop.f32.mrb[2].mxu1 }
 0x520   :  { %v428_v27 = vadd.f32 %v1320_v9, %v427_v26  ;;  %v1039_v28 = vpop.f32.mrb[3].mxu1 }
 0x521   :  { %v943_v28 = vld [vmem:[%s1469_s2 + $0xa] sm:$0x3] }
 0x522   :  { %455 = vrot.lane.b32.xlu1 %v428_v27, %s1246_s28  ;;  %443 = vrot.lane.b32.xlu0 %v428_v27, %s1245_s27  ;;  %v433_v30 = vadd.f32 %v927_v29, %v428_v27 }
 0x524   :  { %v928_v31 = vmul.f32 -1.442695, %v433_v30 }
 0x526   :  { %1168 = vpow2.f32 %v928_v31 }
 0x530   :  { %v1169_v32 = vpop.eup %1168 }
 0x531   :  { %v437_v33 = vadd.f32 1.0, %v1169_v32 }
 0x533   :  { %1170 = vrcp.f32 %v437_v33 }
 0x53d   :  { %v1171_v39 = vpop.eup %1170 }
 0x594   :  { %v444_v35 = vpop.permute.xlu0 %443  ;;  %v456_v38 = vpop.permute.xlu1 %455 }
 0x595   :  { %v446_v36 = vadd.f32 %v929_v34, %v444_v35  ;;  %v458_v40 = vmul.f32 %v1171_v39, %v456_v38 }
 0x597   :  { %v930_v37 = vmul.f32 -1.442695, %v446_v36  ;;  %v459_v43 = vadd.f32 %v931_v41, %v458_v40  ;;  %v945_v41 = vld [vmem:[%s1467_s0 + $0xc] sm:$0x3] }
 0x599   :  { %1172 = vpow2.f32 %v930_v37 }
 0x5a3   :  { %v1173_v42 = vpop.eup %1172 }
 0x5a4   :  { %v450_v44 = vadd.f32 1.0, %v1173_v42 }
 0x5a6   :  { %1174 = vrcp.f32 %v450_v44 }
 0x5a7   :  { %1176 = vtanh.f32 %v459_v43 }
 0x5b0   :  { %v1175_v45 = vpop.eup %1174 }
 0x5b1   :  { %v461_v46 = vsub.f32 1.0, %v1175_v45  ;;  %v1177_v47 = vpop.eup %1176  ;;  %v463_v49 = vmul.f32 %v1175_v45, %v357_v25 }
 0x5b3   :  { %v462_v48 = vmul.f32 %v1177_v47, %v461_v46  ;;  %v947_v46 = vld [vmem:[%s1468_s1 + $0xc] sm:$0x3] }
 0x5b5   :  { %v464_v50 = vadd.f32 %v463_v49, %v462_v48 }
 0x5b7   :  { %1049 = vmatmul.mubr.msk.f32.vlgmr.msra.gmra.mrb[4].mxu0 %vm39_vm2, %v464_v50 }
 0x5b8   :  { %1122 = vmatpush3.bf16.msra.mxu0 %v1288_v4  ;;  %1070 = vmatprep.mubr.msk.f32.mxu0 %vm1243_vm0, %v1244_v6 }
 0x5b9   :  { %1123 = vmatprep.subr.bf16.mxu0 %v1242_v3 }
 0x5bc   :  { %1125 = vmatpush3.bf16.msra.mxu0 %v1301_v7 }
 0x68a   :  { %v534_v51 = vpop.f32.mrb[4].mxu0 }
 0x68b   :  { %v535_v52 = vadd.f32 %v1320_v9, %v534_v51  ;;  %v1050_v53 = vpop.f32.mrb[5].mxu0 }
 0x68c   :  { %v949_v53 = vld [vmem:[%s1469_s2 + $0xc] sm:$0x3] }
 0x68d   :  { %562 = vrot.lane.b32.xlu1 %v535_v52, %s1246_s28  ;;  %550 = vrot.lane.b32.xlu0 %v535_v52, %s1245_s27  ;;  %v540_v55 = vadd.f32 %v933_v54, %v535_v52 }
 0x68f   :  { %v934_v56 = vmul.f32 -1.442695, %v540_v55 }
 0x691   :  { %1178 = vpow2.f32 %v934_v56 }
 0x69b   :  { %v1179_v57 = vpop.eup %1178 }
 0x69c   :  { %v544_v58 = vadd.f32 1.0, %v1179_v57 }
 0x69e   :  { %1180 = vrcp.f32 %v544_v58 }
 0x6a8   :  { %v1181_v0 = vpop.eup %1180 }
 0x6ff   :  { %v551_v60 = vpop.permute.xlu0 %550  ;;  %v563_v63 = vpop.permute.xlu1 %562 }
 0x700   :  { %v553_v61 = vadd.f32 %v935_v59, %v551_v60  ;;  %v565_v1 = vmul.f32 %v1181_v0, %v563_v63 }
 0x702   :  { %v936_v62 = vmul.f32 -1.442695, %v553_v61  ;;  %v566_v8 = vadd.f32 %v937_v2, %v565_v1  ;;  %v951_v2 = vld [vmem:[%s1467_s0 + $0xe] sm:$0x3]  ;;  %s1247_s0 = smov [#allocation3]  }
 0x704   :  { %1182 = vpow2.f32 %v936_v62 }
 0x70e   :  { %v1183_v5 = vpop.eup %1182 }
 0x70f   :  { %v557_v10 = vadd.f32 1.0, %v1183_v5 }
 0x711   :  { %1184 = vrcp.f32 %v557_v10 }
 0x712   :  { %1186 = vtanh.f32 %v566_v8 }
 0x71b   :  { %v1185_v11 = vpop.eup %1184 }
 0x71c   :  { %v568_v12 = vsub.f32 1.0, %v1185_v11  ;;  %v1187_v13 = vpop.eup %1186  ;;  %v570_v15 = vmul.f32 %v1185_v11, %v464_v50 }
 0x71e   :  { %v569_v14 = vmul.f32 %v1187_v13, %v568_v12  ;;  %v953_v12 = vld [vmem:[%s1468_s1 + $0xe] sm:$0x3] }
 0x720   :  { %v571_v16 = vadd.f32 %v570_v15, %v569_v14 }
 0x722   :  { %1060 = vmatmul.mubr.msk.f32.vlgmr.msra.gmra.mrb[4].mxu1 %vm39_vm2, %v571_v16 }
 0x723   :  { %1128 = vmatpush3.bf16.msra.mxu1 %v1288_v4  ;;  %1081 = vmatprep.mubr.msk.f32.mxu1 %vm1243_vm0, %v1244_v6 }
 0x724   :  { %1129 = vmatprep.subr.bf16.mxu1 %v1242_v3  ;;  %v941_v3 = vld [vmem:[%s1468_s1 + $0xa] sm:$0x3]  ;;  %s902_s1 = sshll.u32 %s1247_s0, 4  ;;  %s903_s1 = int_to_ptr.vmem [resolvable:$true] %s902_s1 }
 0x725   :  { %s1218_s24 = scalar_lea.vmem %s903_s1, 32  ;;  %p1223_p1 = scmp.lt.s32.totalorder %s903_s1, %s903_s1 }
 0x726   :  { %p1219_p0 = scmp.ne.s32.totalorder %s903_s1, %s1218_s24  ;;  %p1224_p2 = scmp.lt.s32.totalorder %s1218_s24, %s1218_s24 }
 0x727   :  { %1131 = vmatpush3.bf16.msra.mxu1 %v1301_v7 }
 0x728   :  { %p1225_p3 = por %p1224_p2, %p1223_p1 }
 0x72a   :  { %p1226_p4 = pnand %p1225_p3, %p1219_p0 }
 0x7f5   :  { %v641_v17 = vpop.f32.mrb[4].mxu1 }
 0x7f6   :  { %v642_v18 = vadd.f32 %v1320_v9, %v641_v17  ;;  %v1061_v19 = vpop.f32.mrb[5].mxu1 }
 0x7f8   :  { %669 = vrot.lane.b32.xlu1 %v642_v18, %s1246_s28  ;;  %657 = vrot.lane.b32.xlu0 %v642_v18, %s1245_s27  ;;  %v647_v4 = vadd.f32 %v939_v20, %v642_v18  ;;  %v955_v18 = vld [vmem:[%s1469_s2 + $0xe] sm:$0x3] }
 0x7fa   :  { %v940_v21 = vmul.f32 -1.442695, %v647_v4 }
 0x7fc   :  { %1188 = vpow2.f32 %v940_v21 }
 0x806   :  { %v1189_v6 = vpop.eup %1188 }
 0x807   :  { %v651_v22 = vadd.f32 1.0, %v1189_v6 }
 0x809   :  { %1190 = vrcp.f32 %v651_v22 }
 0x813   :  { %v1191_v26 = vpop.eup %1190 }
 0x86a   :  { %v658_v7 = vpop.permute.xlu0 %657  ;;  %v670_v25 = vpop.permute.xlu1 %669 }
 0x86b   :  { %v660_v23 = vadd.f32 %v941_v3, %v658_v7  ;;  %v672_v27 = vmul.f32 %v1191_v26, %v670_v25 }
 0x86d   :  { %v942_v24 = vmul.f32 -1.442695, %v660_v23  ;;  %v673_v30 = vadd.f32 %v943_v28, %v672_v27 }
 0x86f   :  { %1192 = vpow2.f32 %v942_v24 }
 0x879   :  { %v1193_v29 = vpop.eup %1192 }
 0x87a   :  { %v664_v31 = vadd.f32 1.0, %v1193_v29 }
 0x87c   :  { %1194 = vrcp.f32 %v664_v31 }
 0x87d   :  { %1196 = vtanh.f32 %v673_v30 }
 0x886   :  { %v1195_v32 = vpop.eup %1194 }
 0x887   :  { %v675_v33 = vsub.f32 1.0, %v1195_v32  ;;  %v1197_v34 = vpop.eup %1196  ;;  %v677_v36 = vmul.f32 %v1195_v32, %v571_v16 }
 0x889   :  { %v676_v35 = vmul.f32 %v1197_v34, %v675_v33 }
 0x88b   :  { %v678_v37 = vadd.f32 %v677_v36, %v676_v35 }
 0x88d   :  { %1071 = vmatmul.mubr.msk.f32.vlgmr.msra.gmra.mrb[6].mxu0 %vm39_vm2, %v678_v37 }
 0x960   :  { %v748_v38 = vpop.f32.mrb[6].mxu0 }
 0x961   :  { %v749_v39 = vadd.f32 %v1320_v9, %v748_v38  ;;  %v1072_v40 = vpop.f32.mrb[7].mxu0 }
 0x963   :  { %776 = vrot.lane.b32.xlu1 %v749_v39, %s1246_s28  ;;  %764 = vrot.lane.b32.xlu0 %v749_v39, %s1245_s27  ;;  %v754_v42 = vadd.f32 %v945_v41, %v749_v39 }
 0x965   :  { %v946_v43 = vmul.f32 -1.442695, %v754_v42 }
 0x967   :  { %1198 = vpow2.f32 %v946_v43 }
 0x971   :  { %v1199_v44 = vpop.eup %1198 }
 0x972   :  { %v758_v45 = vadd.f32 1.0, %v1199_v44 }
 0x974   :  { %1200 = vrcp.f32 %v758_v45 }
 0x97e   :  { %v1201_v51 = vpop.eup %1200 }
 0x9d5   :  { %v765_v47 = vpop.permute.xlu0 %764  ;;  %v777_v50 = vpop.permute.xlu1 %776 }
 0x9d6   :  { %v767_v48 = vadd.f32 %v947_v46, %v765_v47  ;;  %v779_v52 = vmul.f32 %v1201_v51, %v777_v50 }
 0x9d8   :  { %v948_v49 = vmul.f32 -1.442695, %v767_v48  ;;  %v780_v55 = vadd.f32 %v949_v53, %v779_v52 }
 0x9da   :  { %1202 = vpow2.f32 %v948_v49 }
 0x9e4   :  { %v1203_v54 = vpop.eup %1202 }
 0x9e5   :  { %v771_v56 = vadd.f32 1.0, %v1203_v54 }
 0x9e7   :  { %1204 = vrcp.f32 %v771_v56 }
 0x9e8   :  { %1206 = vtanh.f32 %v780_v55 }
 0x9f1   :  { %v1205_v57 = vpop.eup %1204 }
 0x9f2   :  { %v782_v58 = vsub.f32 1.0, %v1205_v57  ;;  %v1207_v59 = vpop.eup %1206  ;;  %v784_v61 = vmul.f32 %v1205_v57, %v678_v37 }
 0x9f4   :  { %v783_v60 = vmul.f32 %v1207_v59, %v782_v58 }
 0x9f6   :  { %v785_v62 = vadd.f32 %v784_v61, %v783_v60 }
 0x9f8   :  { %1082 = vmatmul.mubr.msk.f32.vlgmr.msra.gmra.mrb[6].mxu1 %vm39_vm2, %v785_v62 }
 0xacb   :  { %v855_v63 = vpop.f32.mrb[6].mxu1 }
 0xacc   :  { %v856_v0 = vadd.f32 %v1320_v9, %v855_v63  ;;  %v1083_v1 = vpop.f32.mrb[7].mxu1 }
 0xace   :  { %883 = vrot.lane.b32.xlu1 %v856_v0, %s1246_s28  ;;  %871 = vrot.lane.b32.xlu0 %v856_v0, %s1245_s27  ;;  %v861_v5 = vadd.f32 %v951_v2, %v856_v0 }
 0xad0   :  { %v952_v8 = vmul.f32 -1.442695, %v861_v5 }
 0xad2   :  { %1208 = vpow2.f32 %v952_v8 }
 0xadc   :  { %v1209_v10 = vpop.eup %1208 }
 0xadd   :  { %v865_v11 = vadd.f32 1.0, %v1209_v10 }
 0xadf   :  { %1210 = vrcp.f32 %v865_v11 }
 0xae9   :  { %v1211_v16 = vpop.eup %1210 }
 0xb40   :  { %v872_v13 = vpop.permute.xlu0 %871  ;;  %v884_v15 = vpop.permute.xlu1 %883 }
 0xb41   :  { %v874_v9 = vadd.f32 %v953_v12, %v872_v13  ;;  %v886_v17 = vmul.f32 %v1211_v16, %v884_v15 }
 0xb43   :  { %v954_v14 = vmul.f32 -1.442695, %v874_v9  ;;  %v887_v20 = vadd.f32 %v955_v18, %v886_v17 }
 0xb45   :  { %1212 = vpow2.f32 %v954_v14 }
 0xb4f   :  { %v1213_v19 = vpop.eup %1212 }
 0xb50   :  { %v878_v4 = vadd.f32 1.0, %v1213_v19 }
 0xb52   :  { %1214 = vrcp.f32 %v878_v4 }
 0xb53   :  { %1216 = vtanh.f32 %v887_v20 }
 0xb5c   :  { %v1215_v21 = vpop.eup %1214 }
 0xb5d   :  { %v889_v6 = vsub.f32 1.0, %v1215_v21  ;;  %v1217_v22 = vpop.eup %1216  ;;  %v891_v7 = vmul.f32 %v1215_v21, %v785_v62 }
 0xb5f   :  { %v890_v3 = vmul.f32 %v1217_v22, %v889_v6 }
 0xb61   :  { %v892_v23 = vadd.f32 %v891_v7, %v890_v3 }
 0xb63   :  { %894 = vst.msk [vmem:[#allocation2] sm:$0x3] %vm25_vm1, %v892_v23  ;;  %895 = vst.msk [vmem:[#allocation3] sm:$0x3] %vm25_vm1, %v892_v23 }
 0xb64   :  { %1229 = shalt.err (!%p1226_p4)
}
 0xb65   :  { %s1230_s3 = scalar_lea.hbm %s1472_s5, 32 }
 0xb66   :  { %p1231_p5 = scmp.ne.s32.totalorder %s1472_s5, %s1230_s3  ;;  %p1234_p6 = scmp.lt.u32.totalorder %s1230_s3, %s1472_s5 }
 0xb68   :  { %p1236_p7 = pnand %p1234_p6, %p1231_p5 }
 0xb6a   :  { %1239 = shalt.err (!%p1236_p7)
}
 0xb6b   :  { %905 = dma.vmem_to_hbm [thread:$0]  %s903_s1, 32, %s1472_s5, [#allocation4]  }
 0xb6c   :  { %1240 = dma.done.wait [#allocation4], 32  }
 0xb6d   :  { %1241 = vsyncadd [#allocation4], 4294967264 }
 0xb6e   :  { %909 = vsyncpa [#allocation4], 1 }

</bundles_post_ra>
